<compile_context>
chip_gen: v6e
topology: v6e:2x2x1
jax: 0.10.0
libtpu: 0.0.40
codegen_flags: <defaults>
</compile_context>

<pallas_src>
import functools
import math

import jax
import jax.numpy as jnp
from jax.experimental import pallas as pl
from jax.experimental.pallas import tpu as pltpu


def _layer_norm(x, w, b, eps=1e-5):
    mu = jnp.mean(x, axis=-1, keepdims=True)
    xc = x - mu
    var = jnp.mean(xc * xc, axis=-1, keepdims=True)
    return xc * jax.lax.rsqrt(var + eps) * w + b


def transformer_block_kernel(
    x_ref,
    ln1_w_ref, ln1_b_ref,
    wq_ref, bq_ref, wk_ref, bk_ref, wv_ref, bv_ref,   # pre-split, pre-transposed
    wo_ref, bo_ref,                                    # out-proj, pre-transposed
    ln2_w_ref, ln2_b_ref,
    w1a_ref, b1a_ref, w1b_ref, b1b_ref,                # SwiGLU halves, pre-transposed
    w2_ref, b2_ref,                                    # SwiGLU down-proj, pre-transposed
    o_ref,
    *, n_heads: int, compute_dtype,
):
    f32 = jnp.float32
    cdt = compute_dtype

    xb = x_ref[...]                                    # (Bt, S, D)
    Bt, S, D = xb.shape
    hd = D // n_heads
    scale = 1.0 / math.sqrt(hd)
    N = Bt * S

    x = xb.reshape(N, D).astype(f32)                   # flatten rows for dense math

    # ---- attention branch (pre-LN) ----
    xn = _layer_norm(x, ln1_w_ref[0], ln1_b_ref[0])
    xn_c = xn.astype(cdt)

    # QKV from pre-split / pre-transposed weights: three (N,D)x(D,D) dots,
    # no in-kernel transpose and no lane-slicing of a fused (N,3D) output.
    q = jnp.dot(xn_c, wq_ref[...], preferred_element_type=f32) + bq_ref[0]
    k = jnp.dot(xn_c, wk_ref[...], preferred_element_type=f32) + bk_ref[0]
    v = jnp.dot(xn_c, wv_ref[...], preferred_element_type=f32) + bv_ref[0]

    # (N, D) -> (n_heads*Bt, S, hd).  Static lane slices + leading-axis stack +
    # a pure major-dim regroup; with production hd >= 128 a lane-aligned reshape
    # would be preferable.
    def split_heads(t):
        th = jnp.stack([t[:, h * hd:(h + 1) * hd] for h in range(n_heads)], axis=0)
        return th.reshape(n_heads * Bt, S, hd)

    qh = split_heads(q).astype(cdt)
    kh = split_heads(k).astype(cdt)
    vh = split_heads(v).astype(cdt)

    # Batched attention over batch dim = n_heads * Bt (single MXU op per einsum).
    s = jnp.einsum("bqd,bkd->bqk", qh, kh, preferred_element_type=f32) * scale
    m = jnp.max(s, axis=-1, keepdims=True)
    e = jnp.exp(s - m)
    p = e * pl.reciprocal(jnp.sum(e, axis=-1, keepdims=True), approx=True)
    o = jnp.einsum("bqk,bkd->bqd", p.astype(cdt), vh, preferred_element_type=f32)

    # (n_heads*Bt, S, hd) -> (N, D)
    o = o.reshape(n_heads, N, hd)
    attn = jnp.concatenate([o[h] for h in range(n_heads)], axis=-1)
    attn = jnp.dot(attn.astype(cdt), wo_ref[...], preferred_element_type=f32) + bo_ref[0]

    # TODO(synk): attn internal dropout, attn_dropout and MLP dropout are identity (eval mode).
    xr = x + attn

    # ---- MLP branch (pre-LN SwiGLU) ----
    xn2 = _layer_norm(xr, ln2_w_ref[0], ln2_b_ref[0]).astype(cdt)
    h1 = jnp.dot(xn2, w1a_ref[...], preferred_element_type=f32) + b1a_ref[0]
    h2 = jnp.dot(xn2, w1b_ref[...], preferred_element_type=f32) + b1b_ref[0]
    g = (h1 * jax.nn.sigmoid(h1) * h2).astype(cdt)     # SiLU(x1) * x2
    mlp = jnp.dot(g, w2_ref[...], preferred_element_type=f32) + b2_ref[0]

    o_ref[...] = (xr + mlp).reshape(Bt, S, D).astype(o_ref.dtype)


def _pick_block_b(B, S, target_rows=256, min_steps=2):
    """Largest batch block that divides B, keeps block_b*S <= target_rows and
    (when possible) leaves >= min_steps grid steps (megacore / pipelining)."""
    divisors = [bb for bb in range(1, B + 1) if B % bb == 0]
    fitting = [bb for bb in divisors if bb * S <= target_rows] or [1]
    stepped = [bb for bb in fitting if B // bb >= min_steps]
    return max(stepped or fitting)


def transformer_block(x, params, n_heads, *, compute_dtype=None, block_b=None):
    """params use PyTorch layouts:
       in_w (3D,D), in_b (3D,), out_w (D,D), out_b (D,),
       w1 (2H,D), b1 (2H,), w2 (D,H), b2 (D,), ln* (D,)."""
    B, S, D = x.shape
    H = params["w1"].shape[0] // 2
    f32 = jnp.float32
    cdt = compute_dtype if compute_dtype is not None else f32

    # Host-side weight prep (free): transpose so in-kernel dots contract on the
    # natural (K-sublane, N-lane) layout and split fused QKV / SwiGLU weights so
    # the kernel never slices fused matmul outputs on non-128 lane boundaries.
    in_w, in_b = params["in_w"], params["in_b"]
    w1, b1 = params["w1"], params["b1"]

    def _w(m):      # weight matrices feed the MXU: cast to compute dtype
        return m.astype(cdt)

    def _r(vec):    # biases / LN params stay f32, shaped (1, N) for 2-D layout
        return vec.reshape(1, -1).astype(f32)

    param_list = [
        _r(params["ln1_w"]), _r(params["ln1_b"]),
        _w(in_w[:D].T), _r(in_b[:D]),
        _w(in_w[D:2 * D].T), _r(in_b[D:2 * D]),
        _w(in_w[2 * D:].T), _r(in_b[2 * D:]),
        _w(params["out_w"].T), _r(params["out_b"]),
        _r(params["ln2_w"]), _r(params["ln2_b"]),
        _w(w1[:H].T), _r(b1[:H]),
        _w(w1[H:].T), _r(b1[H:]),
        _w(params["w2"].T), _r(params["b2"]),
    ]

    if block_b is None:
        block_b = _pick_block_b(B, S)
    assert B % block_b == 0, "block_b must divide the batch"
    grid = (B // block_b,)

    x_spec = pl.BlockSpec((block_b, S, D), lambda b: (b, 0, 0))
    param_specs = [pl.BlockSpec(p.shape, lambda b: (0, 0)) for p in param_list]

    return pl.pallas_call(
        functools.partial(transformer_block_kernel,
                          n_heads=n_heads, compute_dtype=cdt),
        out_shape=jax.ShapeDtypeStruct((B, S, D), x.dtype),
        grid=grid,
        in_specs=[x_spec] + param_specs,
        out_specs=x_spec,
        compiler_params=pltpu.CompilerParams(
            dimension_semantics=("parallel",),
            vmem_limit_bytes=48 * 1024 * 1024,   # safe on v7x's 64 MiB VMEM
        ),
    )(x, *param_list)


def _reference(x, params, n_heads):
    """Plain-JAX reference (PyTorch TransformerBlock, eval mode)."""
    B, S, D = x.shape
    hd = D // n_heads

    def ln(t, w, b, eps=1e-5):
        mu = jnp.mean(t, axis=-1, keepdims=True)
        var = jnp.mean((t - mu) ** 2, axis=-1, keepdims=True)
        return (t - mu) / jnp.sqrt(var + eps) * w + b

    xn = ln(x, params["ln1_w"], params["ln1_b"])
    qkv = xn @ params["in_w"].T + params["in_b"]
    q, k, v = jnp.split(qkv, 3, axis=-1)
    q = q.reshape(B, S, n_heads, hd).transpose(0, 2, 1, 3)
    k = k.reshape(B, S, n_heads, hd).transpose(0, 2, 1, 3)
    v = v.reshape(B, S, n_heads, hd).transpose(0, 2, 1, 3)
    s = jnp.einsum("bhqd,bhkd->bhqk", q, k) / math.sqrt(hd)
    p = jax.nn.softmax(s, axis=-1)
    a = jnp.einsum("bhqk,bhkd->bhqd", p, v).transpose(0, 2, 1, 3).reshape(B, S, D)
    a = a @ params["out_w"].T + params["out_b"]
    x = x + a
    xn2 = ln(x, params["ln2_w"], params["ln2_b"])
    h = xn2 @ params["w1"].T + params["b1"]
    x1, x2 = jnp.split(h, 2, axis=-1)
    return x + (jax.nn.silu(x1) * x2) @ params["w2"].T + params["b2"]


if __name__ == "__main__":
    # config: embed_dim=32, num_heads=4, mlp_ratio=4 -> hidden=128
    B, S, D = 2, 8, 32
    n_heads = 4
    mlp_ratio = 4
    H = mlp_ratio * D

    key = jax.random.PRNGKey(0)
    ks = jax.random.split(key, 9)
    f32 = jnp.float32

    params = {
        "ln1_w": jnp.ones((D,), f32),
        "ln1_b": jnp.zeros((D,), f32),
        "in_w":  (0.02 * jax.random.normal(ks[0], (3 * D, D))).astype(f32),
        "in_b":  (0.02 * jax.random.normal(ks[1], (3 * D,))).astype(f32),
        "out_w": (0.02 * jax.random.normal(ks[2], (D, D))).astype(f32),
        "out_b": (0.02 * jax.random.normal(ks[3], (D,))).astype(f32),
        "ln2_w": jnp.ones((D,), f32),
        "ln2_b": jnp.zeros((D,), f32),
        "w1":    (0.02 * jax.random.normal(ks[4], (2 * H, D))).astype(f32),
        "b1":    (0.02 * jax.random.normal(ks[5], (2 * H,))).astype(f32),
        "w2":    (0.02 * jax.random.normal(ks[6], (D, H))).astype(f32),
        "b2":    (0.02 * jax.random.normal(ks[7], (D,))).astype(f32),
    }
    x = jax.random.normal(ks[8], (B, S, D), dtype=f32)

    ref = _reference(x, params, n_heads)

    # Default (f32 MXU operands) -- tight check.
    out = jax.block_until_ready(transformer_block(x, params, n_heads))
    assert out.shape == (B, S, D)
    assert jnp.allclose(out, ref, atol=1e-3, rtol=1e-3), \
        float(jnp.max(jnp.abs(out - ref)))

    # bf16 MXU operands with f32 accumulation (v6e/v7x fast path) -- loose check.
    out_bf16 = jax.block_until_ready(
        transformer_block(x, params, n_heads, compute_dtype=jnp.bfloat16))
    assert jnp.allclose(out_bf16, ref, atol=5e-2, rtol=5e-2)

    print("KERNEL_OK")
</pallas_src>

<mosaic_0001>
module attributes {stable_mosaic.version = 11 : i64} {
  func.func @transformer_block_kernel(%arg0: i32, %arg1: memref<1x8x32xf32, #tpu.memory_space<vmem>>, %arg2: memref<1x32xf32, #tpu.memory_space<vmem>>, %arg3: memref<1x32xf32, #tpu.memory_space<vmem>>, %arg4: memref<32x32xf32, #tpu.memory_space<vmem>>, %arg5: memref<1x32xf32, #tpu.memory_space<vmem>>, %arg6: memref<32x32xf32, #tpu.memory_space<vmem>>, %arg7: memref<1x32xf32, #tpu.memory_space<vmem>>, %arg8: memref<32x32xf32, #tpu.memory_space<vmem>>, %arg9: memref<1x32xf32, #tpu.memory_space<vmem>>, %arg10: memref<32x32xf32, #tpu.memory_space<vmem>>, %arg11: memref<1x32xf32, #tpu.memory_space<vmem>>, %arg12: memref<1x32xf32, #tpu.memory_space<vmem>>, %arg13: memref<1x32xf32, #tpu.memory_space<vmem>>, %arg14: memref<32x128xf32, #tpu.memory_space<vmem>>, %arg15: memref<1x128xf32, #tpu.memory_space<vmem>>, %arg16: memref<32x128xf32, #tpu.memory_space<vmem>>, %arg17: memref<1x128xf32, #tpu.memory_space<vmem>>, %arg18: memref<128x32xf32, #tpu.memory_space<vmem>>, %arg19: memref<1x32xf32, #tpu.memory_space<vmem>>, %arg20: memref<1x8x32xf32, #tpu.memory_space<vmem>>) attributes {dimension_semantics = [#tpu.dimension_semantics<parallel>], iteration_bounds = array<i64: 2>, scalar_prefetch = 0 : i64, scratch_operands = 0 : i64, tpu.core_type = #tpu.core_type<tc>, window_params = [{transform_indices = @transform_0, window_bounds = array<i64: 1, 8, 32>}, {pipeline_mode = #tpu.pipeline_mode<synchronous>, transform_indices = @transform_1, window_bounds = array<i64: 1, 32>}, {pipeline_mode = #tpu.pipeline_mode<synchronous>, transform_indices = @transform_2, window_bounds = array<i64: 1, 32>}, {pipeline_mode = #tpu.pipeline_mode<synchronous>, transform_indices = @transform_3, window_bounds = array<i64: 32, 32>}, {pipeline_mode = #tpu.pipeline_mode<synchronous>, transform_indices = @transform_4, window_bounds = array<i64: 1, 32>}, {pipeline_mode = #tpu.pipeline_mode<synchronous>, transform_indices = @transform_5, window_bounds = array<i64: 32, 32>}, {pipeline_mode = #tpu.pipeline_mode<synchronous>, transform_indices = @transform_6, window_bounds = array<i64: 1, 32>}, {pipeline_mode = #tpu.pipeline_mode<synchronous>, transform_indices = @transform_7, window_bounds = array<i64: 32, 32>}, {pipeline_mode = #tpu.pipeline_mode<synchronous>, transform_indices = @transform_8, window_bounds = array<i64: 1, 32>}, {pipeline_mode = #tpu.pipeline_mode<synchronous>, transform_indices = @transform_9, window_bounds = array<i64: 32, 32>}, {pipeline_mode = #tpu.pipeline_mode<synchronous>, transform_indices = @transform_10, window_bounds = array<i64: 1, 32>}, {pipeline_mode = #tpu.pipeline_mode<synchronous>, transform_indices = @transform_11, window_bounds = array<i64: 1, 32>}, {pipeline_mode = #tpu.pipeline_mode<synchronous>, transform_indices = @transform_12, window_bounds = array<i64: 1, 32>}, {pipeline_mode = #tpu.pipeline_mode<synchronous>, transform_indices = @transform_13, window_bounds = array<i64: 32, 128>}, {pipeline_mode = #tpu.pipeline_mode<synchronous>, transform_indices = @transform_14, window_bounds = array<i64: 1, 128>}, {pipeline_mode = #tpu.pipeline_mode<synchronous>, transform_indices = @transform_15, window_bounds = array<i64: 32, 128>}, {pipeline_mode = #tpu.pipeline_mode<synchronous>, transform_indices = @transform_16, window_bounds = array<i64: 1, 128>}, {pipeline_mode = #tpu.pipeline_mode<synchronous>, transform_indices = @transform_17, window_bounds = array<i64: 128, 32>}, {pipeline_mode = #tpu.pipeline_mode<synchronous>, transform_indices = @transform_18, window_bounds = array<i64: 1, 32>}, {transform_indices = @transform_19, window_bounds = array<i64: 1, 8, 32>}]} {
    %c0 = arith.constant 0 : index
    %c0_0 = arith.constant 0 : index
    %c0_1 = arith.constant 0 : index
    %0 = vector.load %arg1[%c0, %c0_0, %c0_1] : memref<1x8x32xf32, #tpu.memory_space<vmem>>, vector<1x8x32xf32>
    %1 = vector.shape_cast %0 : vector<1x8x32xf32> to vector<8x32xf32>
    %c0_2 = arith.constant 0 : index
    %c0_3 = arith.constant 0 : index
    %2 = vector.load %arg2[%c0_2, %c0_3] : memref<1x32xf32, #tpu.memory_space<vmem>>, vector<1x32xf32>
    %3 = vector.shape_cast %2 : vector<1x32xf32> to vector<32xf32>
    %c0_4 = arith.constant 0 : index
    %c0_5 = arith.constant 0 : index
    %4 = vector.load %arg3[%c0_4, %c0_5] : memref<1x32xf32, #tpu.memory_space<vmem>>, vector<1x32xf32>
    %5 = vector.shape_cast %4 : vector<1x32xf32> to vector<32xf32>
    %cst = arith.constant dense<0.000000e+00> : vector<8xf32>
    %6 = vector.multi_reduction <add>, %1, %cst [1] : vector<8x32xf32> to vector<8xf32>
    %7 = vector.shape_cast %6 : vector<8xf32> to vector<8x1xf32>
    %cst_6 = arith.constant 3.200000e+01 : f32
    %8 = vector.broadcast %cst_6 : f32 to vector<8x1xf32>
    %9 = arith.divf %7, %8 : vector<8x1xf32>
    %10 = vector.broadcast %9 : vector<8x1xf32> to vector<8x32xf32>
    %11 = arith.subf %1, %10 : vector<8x32xf32>
    %12 = arith.mulf %11, %11 : vector<8x32xf32>
    %cst_7 = arith.constant dense<0.000000e+00> : vector<8xf32>
    %13 = vector.multi_reduction <add>, %12, %cst_7 [1] : vector<8x32xf32> to vector<8xf32>
    %14 = vector.shape_cast %13 : vector<8xf32> to vector<8x1xf32>
    %cst_8 = arith.constant 3.200000e+01 : f32
    %15 = vector.broadcast %cst_8 : f32 to vector<8x1xf32>
    %16 = arith.divf %14, %15 : vector<8x1xf32>
    %cst_9 = arith.constant 9.99999974E-6 : f32
    %17 = vector.broadcast %cst_9 : f32 to vector<8x1xf32>
    %18 = arith.addf %16, %17 : vector<8x1xf32>
    %19 = math.rsqrt %18 : vector<8x1xf32>
    %20 = vector.broadcast %19 : vector<8x1xf32> to vector<8x32xf32>
    %21 = arith.mulf %11, %20 : vector<8x32xf32>
    %22 = vector.shape_cast %3 : vector<32xf32> to vector<1x32xf32>
    %23 = vector.broadcast %22 : vector<1x32xf32> to vector<8x32xf32>
    %24 = arith.mulf %21, %23 : vector<8x32xf32>
    %25 = vector.shape_cast %5 : vector<32xf32> to vector<1x32xf32>
    %26 = vector.broadcast %25 : vector<1x32xf32> to vector<8x32xf32>
    %27 = arith.addf %24, %26 : vector<8x32xf32>
    %c0_10 = arith.constant 0 : index
    %c0_11 = arith.constant 0 : index
    %28 = vector.load %arg4[%c0_10, %c0_11] : memref<32x32xf32, #tpu.memory_space<vmem>>, vector<32x32xf32>
    %cst_12 = arith.constant dense<0.000000e+00> : vector<8x32xf32>
    %29 = tpu.matmul %27, %28, %cst_12 {dimension_numbers = #tpu.dot_dimension_numbers<[1], [0], [0], [1], [0, 0, 1, 1], [], []>} : vector<8x32xf32>, vector<32x32xf32>, vector<8x32xf32> -> vector<8x32xf32>
    %c0_13 = arith.constant 0 : index
    %c0_14 = arith.constant 0 : index
    %30 = vector.load %arg5[%c0_13, %c0_14] : memref<1x32xf32, #tpu.memory_space<vmem>>, vector<1x32xf32>
    %31 = vector.shape_cast %30 : vector<1x32xf32> to vector<32xf32>
    %32 = vector.shape_cast %31 : vector<32xf32> to vector<1x32xf32>
    %33 = vector.broadcast %32 : vector<1x32xf32> to vector<8x32xf32>
    %34 = arith.addf %29, %33 : vector<8x32xf32>
    %c0_15 = arith.constant 0 : index
    %c0_16 = arith.constant 0 : index
    %35 = vector.load %arg6[%c0_15, %c0_16] : memref<32x32xf32, #tpu.memory_space<vmem>>, vector<32x32xf32>
    %cst_17 = arith.constant dense<0.000000e+00> : vector<8x32xf32>
    %36 = tpu.matmul %27, %35, %cst_17 {dimension_numbers = #tpu.dot_dimension_numbers<[1], [0], [0], [1], [0, 0, 1, 1], [], []>} : vector<8x32xf32>, vector<32x32xf32>, vector<8x32xf32> -> vector<8x32xf32>
    %c0_18 = arith.constant 0 : index
    %c0_19 = arith.constant 0 : index
    %37 = vector.load %arg7[%c0_18, %c0_19] : memref<1x32xf32, #tpu.memory_space<vmem>>, vector<1x32xf32>
    %38 = vector.shape_cast %37 : vector<1x32xf32> to vector<32xf32>
    %39 = vector.shape_cast %38 : vector<32xf32> to vector<1x32xf32>
    %40 = vector.broadcast %39 : vector<1x32xf32> to vector<8x32xf32>
    %41 = arith.addf %36, %40 : vector<8x32xf32>
    %c0_20 = arith.constant 0 : index
    %c0_21 = arith.constant 0 : index
    %42 = vector.load %arg8[%c0_20, %c0_21] : memref<32x32xf32, #tpu.memory_space<vmem>>, vector<32x32xf32>
    %cst_22 = arith.constant dense<0.000000e+00> : vector<8x32xf32>
    %43 = tpu.matmul %27, %42, %cst_22 {dimension_numbers = #tpu.dot_dimension_numbers<[1], [0], [0], [1], [0, 0, 1, 1], [], []>} : vector<8x32xf32>, vector<32x32xf32>, vector<8x32xf32> -> vector<8x32xf32>
    %c0_23 = arith.constant 0 : index
    %c0_24 = arith.constant 0 : index
    %44 = vector.load %arg9[%c0_23, %c0_24] : memref<1x32xf32, #tpu.memory_space<vmem>>, vector<1x32xf32>
    %45 = vector.shape_cast %44 : vector<1x32xf32> to vector<32xf32>
    %46 = vector.shape_cast %45 : vector<32xf32> to vector<1x32xf32>
    %47 = vector.broadcast %46 : vector<1x32xf32> to vector<8x32xf32>
    %48 = arith.addf %43, %47 : vector<8x32xf32>
    %49 = vector.extract_strided_slice %34 {offsets = [0, 0], sizes = [8, 8], strides = [1, 1]} : vector<8x32xf32> to vector<8x8xf32>
    %50 = vector.extract_strided_slice %34 {offsets = [0, 8], sizes = [8, 8], strides = [1, 1]} : vector<8x32xf32> to vector<8x8xf32>
    %51 = vector.extract_strided_slice %34 {offsets = [0, 16], sizes = [8, 8], strides = [1, 1]} : vector<8x32xf32> to vector<8x8xf32>
    %52 = vector.extract_strided_slice %34 {offsets = [0, 24], sizes = [8, 8], strides = [1, 1]} : vector<8x32xf32> to vector<8x8xf32>
    %53 = vector.shape_cast %49 : vector<8x8xf32> to vector<1x8x8xf32>
    %54 = vector.shape_cast %50 : vector<8x8xf32> to vector<1x8x8xf32>
    %55 = vector.shape_cast %51 : vector<8x8xf32> to vector<1x8x8xf32>
    %56 = vector.shape_cast %52 : vector<8x8xf32> to vector<1x8x8xf32>
    %57 = tpu.concatenate %53, %54, %55, %56 in 0 : vector<1x8x8xf32>, vector<1x8x8xf32>, vector<1x8x8xf32>, vector<1x8x8xf32> -> vector<4x8x8xf32>
    %58 = vector.extract_strided_slice %41 {offsets = [0, 0], sizes = [8, 8], strides = [1, 1]} : vector<8x32xf32> to vector<8x8xf32>
    %59 = vector.extract_strided_slice %41 {offsets = [0, 8], sizes = [8, 8], strides = [1, 1]} : vector<8x32xf32> to vector<8x8xf32>
    %60 = vector.extract_strided_slice %41 {offsets = [0, 16], sizes = [8, 8], strides = [1, 1]} : vector<8x32xf32> to vector<8x8xf32>
    %61 = vector.extract_strided_slice %41 {offsets = [0, 24], sizes = [8, 8], strides = [1, 1]} : vector<8x32xf32> to vector<8x8xf32>
    %62 = vector.shape_cast %58 : vector<8x8xf32> to vector<1x8x8xf32>
    %63 = vector.shape_cast %59 : vector<8x8xf32> to vector<1x8x8xf32>
    %64 = vector.shape_cast %60 : vector<8x8xf32> to vector<1x8x8xf32>
    %65 = vector.shape_cast %61 : vector<8x8xf32> to vector<1x8x8xf32>
    %66 = tpu.concatenate %62, %63, %64, %65 in 0 : vector<1x8x8xf32>, vector<1x8x8xf32>, vector<1x8x8xf32>, vector<1x8x8xf32> -> vector<4x8x8xf32>
    %67 = vector.extract_strided_slice %48 {offsets = [0, 0], sizes = [8, 8], strides = [1, 1]} : vector<8x32xf32> to vector<8x8xf32>
    %68 = vector.extract_strided_slice %48 {offsets = [0, 8], sizes = [8, 8], strides = [1, 1]} : vector<8x32xf32> to vector<8x8xf32>
    %69 = vector.extract_strided_slice %48 {offsets = [0, 16], sizes = [8, 8], strides = [1, 1]} : vector<8x32xf32> to vector<8x8xf32>
    %70 = vector.extract_strided_slice %48 {offsets = [0, 24], sizes = [8, 8], strides = [1, 1]} : vector<8x32xf32> to vector<8x8xf32>
    %71 = vector.shape_cast %67 : vector<8x8xf32> to vector<1x8x8xf32>
    %72 = vector.shape_cast %68 : vector<8x8xf32> to vector<1x8x8xf32>
    %73 = vector.shape_cast %69 : vector<8x8xf32> to vector<1x8x8xf32>
    %74 = vector.shape_cast %70 : vector<8x8xf32> to vector<1x8x8xf32>
    %75 = tpu.concatenate %71, %72, %73, %74 in 0 : vector<1x8x8xf32>, vector<1x8x8xf32>, vector<1x8x8xf32>, vector<1x8x8xf32> -> vector<4x8x8xf32>
    "tpu.trace_start"() <{level = 10 : i32, message = "bqd,bkd->bqk"}> : () -> ()
    %cst_25 = arith.constant dense<0.000000e+00> : vector<4x8x8xf32>
    %76 = tpu.matmul %57, %66, %cst_25 {dimension_numbers = #tpu.dot_dimension_numbers<[2], [2], [1], [1], [0, 0, 0, 1, 1, 1], [0], [0]>} : vector<4x8x8xf32>, vector<4x8x8xf32>, vector<4x8x8xf32> -> vector<4x8x8xf32>
    "tpu.trace_stop"() : () -> ()
    %cst_26 = arith.constant 0.353553385 : f32
    %77 = vector.broadcast %cst_26 : f32 to vector<4x8x8xf32>
    %78 = arith.mulf %76, %77 : vector<4x8x8xf32>
    %cst_27 = arith.constant dense<0xFF800000> : vector<4x8xf32>
    %79 = vector.multi_reduction <maximumf>, %78, %cst_27 [2] : vector<4x8x8xf32> to vector<4x8xf32>
    %80 = vector.shape_cast %79 : vector<4x8xf32> to vector<4x8x1xf32>
    %81 = vector.broadcast %80 : vector<4x8x1xf32> to vector<4x8x8xf32>
    %82 = arith.subf %78, %81 : vector<4x8x8xf32>
    %83 = math.exp %82 : vector<4x8x8xf32>
    %cst_28 = arith.constant dense<0.000000e+00> : vector<4x8xf32>
    %84 = vector.multi_reduction <add>, %83, %cst_28 [2] : vector<4x8x8xf32> to vector<4x8xf32>
    %85 = vector.shape_cast %84 : vector<4x8xf32> to vector<4x8x1xf32>
    %86 = tpu.reciprocal %85 {approx = true} : vector<4x8x1xf32> -> vector<4x8x1xf32>
    %87 = vector.broadcast %86 : vector<4x8x1xf32> to vector<4x8x8xf32>
    %88 = arith.mulf %83, %87 : vector<4x8x8xf32>
    "tpu.trace_start"() <{level = 10 : i32, message = "bqk,bkd->bqd"}> : () -> ()
    %cst_29 = arith.constant dense<0.000000e+00> : vector<4x8x8xf32>
    %89 = tpu.matmul %88, %75, %cst_29 {dimension_numbers = #tpu.dot_dimension_numbers<[2], [1], [1], [2], [0, 0, 0, 1, 1, 2], [0], [0]>} : vector<4x8x8xf32>, vector<4x8x8xf32>, vector<4x8x8xf32> -> vector<4x8x8xf32>
    "tpu.trace_stop"() : () -> ()
    %90 = vector.extract_strided_slice %89 {offsets = [0, 0, 0], sizes = [1, 8, 8], strides = [1, 1, 1]} : vector<4x8x8xf32> to vector<1x8x8xf32>
    %91 = vector.shape_cast %90 : vector<1x8x8xf32> to vector<8x8xf32>
    %92 = vector.extract_strided_slice %89 {offsets = [1, 0, 0], sizes = [1, 8, 8], strides = [1, 1, 1]} : vector<4x8x8xf32> to vector<1x8x8xf32>
    %93 = vector.shape_cast %92 : vector<1x8x8xf32> to vector<8x8xf32>
    %94 = vector.extract_strided_slice %89 {offsets = [2, 0, 0], sizes = [1, 8, 8], strides = [1, 1, 1]} : vector<4x8x8xf32> to vector<1x8x8xf32>
    %95 = vector.shape_cast %94 : vector<1x8x8xf32> to vector<8x8xf32>
    %96 = vector.extract_strided_slice %89 {offsets = [3, 0, 0], sizes = [1, 8, 8], strides = [1, 1, 1]} : vector<4x8x8xf32> to vector<1x8x8xf32>
    %97 = vector.shape_cast %96 : vector<1x8x8xf32> to vector<8x8xf32>
    %98 = tpu.concatenate %91, %93, %95, %97 in 1 : vector<8x8xf32>, vector<8x8xf32>, vector<8x8xf32>, vector<8x8xf32> -> vector<8x32xf32>
    %c0_30 = arith.constant 0 : index
    %c0_31 = arith.constant 0 : index
    %99 = vector.load %arg10[%c0_30, %c0_31] : memref<32x32xf32, #tpu.memory_space<vmem>>, vector<32x32xf32>
    %cst_32 = arith.constant dense<0.000000e+00> : vector<8x32xf32>
    %100 = tpu.matmul %98, %99, %cst_32 {dimension_numbers = #tpu.dot_dimension_numbers<[1], [0], [0], [1], [0, 0, 1, 1], [], []>} : vector<8x32xf32>, vector<32x32xf32>, vector<8x32xf32> -> vector<8x32xf32>
    %c0_33 = arith.constant 0 : index
    %c0_34 = arith.constant 0 : index
    %101 = vector.load %arg11[%c0_33, %c0_34] : memref<1x32xf32, #tpu.memory_space<vmem>>, vector<1x32xf32>
    %102 = vector.shape_cast %101 : vector<1x32xf32> to vector<32xf32>
    %103 = vector.shape_cast %102 : vector<32xf32> to vector<1x32xf32>
    %104 = vector.broadcast %103 : vector<1x32xf32> to vector<8x32xf32>
    %105 = arith.addf %100, %104 : vector<8x32xf32>
    %106 = arith.addf %1, %105 : vector<8x32xf32>
    %c0_35 = arith.constant 0 : index
    %c0_36 = arith.constant 0 : index
    %107 = vector.load %arg12[%c0_35, %c0_36] : memref<1x32xf32, #tpu.memory_space<vmem>>, vector<1x32xf32>
    %108 = vector.shape_cast %107 : vector<1x32xf32> to vector<32xf32>
    %c0_37 = arith.constant 0 : index
    %c0_38 = arith.constant 0 : index
    %109 = vector.load %arg13[%c0_37, %c0_38] : memref<1x32xf32, #tpu.memory_space<vmem>>, vector<1x32xf32>
    %110 = vector.shape_cast %109 : vector<1x32xf32> to vector<32xf32>
    %cst_39 = arith.constant dense<0.000000e+00> : vector<8xf32>
    %111 = vector.multi_reduction <add>, %106, %cst_39 [1] : vector<8x32xf32> to vector<8xf32>
    %112 = vector.shape_cast %111 : vector<8xf32> to vector<8x1xf32>
    %cst_40 = arith.constant 3.200000e+01 : f32
    %113 = vector.broadcast %cst_40 : f32 to vector<8x1xf32>
    %114 = arith.divf %112, %113 : vector<8x1xf32>
    %115 = vector.broadcast %114 : vector<8x1xf32> to vector<8x32xf32>
    %116 = arith.subf %106, %115 : vector<8x32xf32>
    %117 = arith.mulf %116, %116 : vector<8x32xf32>
    %cst_41 = arith.constant dense<0.000000e+00> : vector<8xf32>
    %118 = vector.multi_reduction <add>, %117, %cst_41 [1] : vector<8x32xf32> to vector<8xf32>
    %119 = vector.shape_cast %118 : vector<8xf32> to vector<8x1xf32>
    %cst_42 = arith.constant 3.200000e+01 : f32
    %120 = vector.broadcast %cst_42 : f32 to vector<8x1xf32>
    %121 = arith.divf %119, %120 : vector<8x1xf32>
    %cst_43 = arith.constant 9.99999974E-6 : f32
    %122 = vector.broadcast %cst_43 : f32 to vector<8x1xf32>
    %123 = arith.addf %121, %122 : vector<8x1xf32>
    %124 = math.rsqrt %123 : vector<8x1xf32>
    %125 = vector.broadcast %124 : vector<8x1xf32> to vector<8x32xf32>
    %126 = arith.mulf %116, %125 : vector<8x32xf32>
    %127 = vector.shape_cast %108 : vector<32xf32> to vector<1x32xf32>
    %128 = vector.broadcast %127 : vector<1x32xf32> to vector<8x32xf32>
    %129 = arith.mulf %126, %128 : vector<8x32xf32>
    %130 = vector.shape_cast %110 : vector<32xf32> to vector<1x32xf32>
    %131 = vector.broadcast %130 : vector<1x32xf32> to vector<8x32xf32>
    %132 = arith.addf %129, %131 : vector<8x32xf32>
    %c0_44 = arith.constant 0 : index
    %c0_45 = arith.constant 0 : index
    %133 = vector.load %arg14[%c0_44, %c0_45] : memref<32x128xf32, #tpu.memory_space<vmem>>, vector<32x128xf32>
    %cst_46 = arith.constant dense<0.000000e+00> : vector<8x128xf32>
    %134 = tpu.matmul %132, %133, %cst_46 {dimension_numbers = #tpu.dot_dimension_numbers<[1], [0], [0], [1], [0, 0, 1, 1], [], []>} : vector<8x32xf32>, vector<32x128xf32>, vector<8x128xf32> -> vector<8x128xf32>
    %c0_47 = arith.constant 0 : index
    %c0_48 = arith.constant 0 : index
    %135 = vector.load %arg15[%c0_47, %c0_48] : memref<1x128xf32, #tpu.memory_space<vmem>>, vector<1x128xf32>
    %136 = vector.shape_cast %135 : vector<1x128xf32> to vector<128xf32>
    %137 = vector.shape_cast %136 : vector<128xf32> to vector<1x128xf32>
    %138 = vector.broadcast %137 : vector<1x128xf32> to vector<8x128xf32>
    %139 = arith.addf %134, %138 : vector<8x128xf32>
    %c0_49 = arith.constant 0 : index
    %c0_50 = arith.constant 0 : index
    %140 = vector.load %arg16[%c0_49, %c0_50] : memref<32x128xf32, #tpu.memory_space<vmem>>, vector<32x128xf32>
    %cst_51 = arith.constant dense<0.000000e+00> : vector<8x128xf32>
    %141 = tpu.matmul %132, %140, %cst_51 {dimension_numbers = #tpu.dot_dimension_numbers<[1], [0], [0], [1], [0, 0, 1, 1], [], []>} : vector<8x32xf32>, vector<32x128xf32>, vector<8x128xf32> -> vector<8x128xf32>
    %c0_52 = arith.constant 0 : index
    %c0_53 = arith.constant 0 : index
    %142 = vector.load %arg17[%c0_52, %c0_53] : memref<1x128xf32, #tpu.memory_space<vmem>>, vector<1x128xf32>
    %143 = vector.shape_cast %142 : vector<1x128xf32> to vector<128xf32>
    %144 = vector.shape_cast %143 : vector<128xf32> to vector<1x128xf32>
    %145 = vector.broadcast %144 : vector<1x128xf32> to vector<8x128xf32>
    %146 = arith.addf %141, %145 : vector<8x128xf32>
    %147 = arith.negf %139 : vector<8x128xf32>
    %148 = math.exp %147 : vector<8x128xf32>
    %cst_54 = arith.constant 1.000000e+00 : f32
    %149 = vector.broadcast %cst_54 : f32 to vector<8x128xf32>
    %150 = arith.addf %149, %148 : vector<8x128xf32>
    %151 = arith.divf %149, %150 : vector<8x128xf32>
    %152 = arith.mulf %139, %151 : vector<8x128xf32>
    %153 = arith.mulf %152, %146 : vector<8x128xf32>
    %c0_55 = arith.constant 0 : index
    %c0_56 = arith.constant 0 : index
    %154 = vector.load %arg18[%c0_55, %c0_56] : memref<128x32xf32, #tpu.memory_space<vmem>>, vector<128x32xf32>
    %cst_57 = arith.constant dense<0.000000e+00> : vector<8x32xf32>
    %155 = tpu.matmul %153, %154, %cst_57 {dimension_numbers = #tpu.dot_dimension_numbers<[1], [0], [0], [1], [0, 0, 1, 1], [], []>} : vector<8x128xf32>, vector<128x32xf32>, vector<8x32xf32> -> vector<8x32xf32>
    %c0_58 = arith.constant 0 : index
    %c0_59 = arith.constant 0 : index
    %156 = vector.load %arg19[%c0_58, %c0_59] : memref<1x32xf32, #tpu.memory_space<vmem>>, vector<1x32xf32>
    %157 = vector.shape_cast %156 : vector<1x32xf32> to vector<32xf32>
    %158 = vector.shape_cast %157 : vector<32xf32> to vector<1x32xf32>
    %159 = vector.broadcast %158 : vector<1x32xf32> to vector<8x32xf32>
    %160 = arith.addf %155, %159 : vector<8x32xf32>
    %161 = arith.addf %106, %160 : vector<8x32xf32>
    %162 = vector.shape_cast %161 : vector<8x32xf32> to vector<1x8x32xf32>
    %c0_60 = arith.constant 0 : index
    %c0_61 = arith.constant 0 : index
    %c0_62 = arith.constant 0 : index
    %163 = vector.load %arg20[%c0_60, %c0_61, %c0_62] : memref<1x8x32xf32, #tpu.memory_space<vmem>>, vector<1x8x32xf32>
    tpu.vector_store %arg20[%c0_60, %c0_61, %c0_62], %162 {strides = array<i32>} : memref<1x8x32xf32, #tpu.memory_space<vmem>>, vector<1x8x32xf32>,
    return
  }
  func.func @transform_0(%arg0: i32) -> (i32, i32, i32) {
    %c0_i32 = arith.constant 0 : i32
    %c0_i32_0 = arith.constant 0 : i32
    %c0_i32_1 = arith.constant 0 : i32
    return %arg0, %c0_i32, %c0_i32_0 : i32, i32, i32
  }
  func.func @transform_1(%arg0: i32) -> (i32, i32) {
    %c0_i32 = arith.constant 0 : i32
    %c0_i32_0 = arith.constant 0 : i32
    %c0_i32_1 = arith.constant 0 : i32
    return %c0_i32, %c0_i32_0 : i32, i32
  }
  func.func @transform_2(%arg0: i32) -> (i32, i32) {
    %c0_i32 = arith.constant 0 : i32
    %c0_i32_0 = arith.constant 0 : i32
    %c0_i32_1 = arith.constant 0 : i32
    return %c0_i32, %c0_i32_0 : i32, i32
  }
  func.func @transform_3(%arg0: i32) -> (i32, i32) {
    %c0_i32 = arith.constant 0 : i32
    %c0_i32_0 = arith.constant 0 : i32
    %c0_i32_1 = arith.constant 0 : i32
    return %c0_i32, %c0_i32_0 : i32, i32
  }
  func.func @transform_4(%arg0: i32) -> (i32, i32) {
    %c0_i32 = arith.constant 0 : i32
    %c0_i32_0 = arith.constant 0 : i32
    %c0_i32_1 = arith.constant 0 : i32
    return %c0_i32, %c0_i32_0 : i32, i32
  }
  func.func @transform_5(%arg0: i32) -> (i32, i32) {
    %c0_i32 = arith.constant 0 : i32
    %c0_i32_0 = arith.constant 0 : i32
    %c0_i32_1 = arith.constant 0 : i32
    return %c0_i32, %c0_i32_0 : i32, i32
  }
  func.func @transform_6(%arg0: i32) -> (i32, i32) {
    %c0_i32 = arith.constant 0 : i32
    %c0_i32_0 = arith.constant 0 : i32
    %c0_i32_1 = arith.constant 0 : i32
    return %c0_i32, %c0_i32_0 : i32, i32
  }
  func.func @transform_7(%arg0: i32) -> (i32, i32) {
    %c0_i32 = arith.constant 0 : i32
    %c0_i32_0 = arith.constant 0 : i32
    %c0_i32_1 = arith.constant 0 : i32
    return %c0_i32, %c0_i32_0 : i32, i32
  }
  func.func @transform_8(%arg0: i32) -> (i32, i32) {
    %c0_i32 = arith.constant 0 : i32
    %c0_i32_0 = arith.constant 0 : i32
    %c0_i32_1 = arith.constant 0 : i32
    return %c0_i32, %c0_i32_0 : i32, i32
  }
  func.func @transform_9(%arg0: i32) -> (i32, i32) {
    %c0_i32 = arith.constant 0 : i32
    %c0_i32_0 = arith.constant 0 : i32
    %c0_i32_1 = arith.constant 0 : i32
    return %c0_i32, %c0_i32_0 : i32, i32
  }
  func.func @transform_10(%arg0: i32) -> (i32, i32) {
    %c0_i32 = arith.constant 0 : i32
    %c0_i32_0 = arith.constant 0 : i32
    %c0_i32_1 = arith.constant 0 : i32
    return %c0_i32, %c0_i32_0 : i32, i32
  }
  func.func @transform_11(%arg0: i32) -> (i32, i32) {
    %c0_i32 = arith.constant 0 : i32
    %c0_i32_0 = arith.constant 0 : i32
    %c0_i32_1 = arith.constant 0 : i32
    return %c0_i32, %c0_i32_0 : i32, i32
  }
  func.func @transform_12(%arg0: i32) -> (i32, i32) {
    %c0_i32 = arith.constant 0 : i32
    %c0_i32_0 = arith.constant 0 : i32
    %c0_i32_1 = arith.constant 0 : i32
    return %c0_i32, %c0_i32_0 : i32, i32
  }
  func.func @transform_13(%arg0: i32) -> (i32, i32) {
    %c0_i32 = arith.constant 0 : i32
    %c0_i32_0 = arith.constant 0 : i32
    %c0_i32_1 = arith.constant 0 : i32
    return %c0_i32, %c0_i32_0 : i32, i32
  }
  func.func @transform_14(%arg0: i32) -> (i32, i32) {
    %c0_i32 = arith.constant 0 : i32
    %c0_i32_0 = arith.constant 0 : i32
    %c0_i32_1 = arith.constant 0 : i32
    return %c0_i32, %c0_i32_0 : i32, i32
  }
  func.func @transform_15(%arg0: i32) -> (i32, i32) {
    %c0_i32 = arith.constant 0 : i32
    %c0_i32_0 = arith.constant 0 : i32
    %c0_i32_1 = arith.constant 0 : i32
    return %c0_i32, %c0_i32_0 : i32, i32
  }
  func.func @transform_16(%arg0: i32) -> (i32, i32) {
    %c0_i32 = arith.constant 0 : i32
    %c0_i32_0 = arith.constant 0 : i32
    %c0_i32_1 = arith.constant 0 : i32
    return %c0_i32, %c0_i32_0 : i32, i32
  }
  func.func @transform_17(%arg0: i32) -> (i32, i32) {
    %c0_i32 = arith.constant 0 : i32
    %c0_i32_0 = arith.constant 0 : i32
    %c0_i32_1 = arith.constant 0 : i32
    return %c0_i32, %c0_i32_0 : i32, i32
  }
  func.func @transform_18(%arg0: i32) -> (i32, i32) {
    %c0_i32 = arith.constant 0 : i32
    %c0_i32_0 = arith.constant 0 : i32
    %c0_i32_1 = arith.constant 0 : i32
    return %c0_i32, %c0_i32_0 : i32, i32
  }
  func.func @transform_19(%arg0: i32) -> (i32, i32, i32) {
    %c0_i32 = arith.constant 0 : i32
    %c0_i32_0 = arith.constant 0 : i32
    %c0_i32_1 = arith.constant 0 : i32
    return %arg0, %c0_i32, %c0_i32_0 : i32, i32, i32
  }
}

</mosaic_0001>

<bundles_post_ra>
// kernel: tpu_custom_call.1
= control target key start
LH: loop header
LB: loop body
LE: loop exit
PB: predicated region body
PF: predicated region fallthrough
CT: control target
= control target key end

     0   :  { %s3075_s0 = inlined_call_operand.hbm [shape: f32[2,8,32], index: 0, kind: input, shape index: {}]   ;;  %s3076_s1 = inlined_call_operand.vmem [shape: f32[1,32], index: 1, kind: input, shape index: {}]   ;;  %s3077_s2 = inlined_call_operand.vmem [shape: f32[1,32], index: 2, kind: input, shape index: {}]   ;;  %s3078_s3 = inlined_call_operand.vmem [shape: f32[32,32], index: 3, kind: input, shape index: {}]   ;;  %s3079_s4 = inlined_call_operand.vmem [shape: f32[1,32], index: 4, kind: input, shape index: {}]   ;;  %s3080_s5 = inlined_call_operand.vmem [shape: f32[32,32], index: 5, kind: input, shape index: {}]   ;;  %s3081_s6 = inlined_call_operand.vmem [shape: f32[1,32], index: 6, kind: input, shape index: {}]   ;;  %s3082_s7 = inlined_call_operand.vmem [shape: f32[32,32], index: 7, kind: input, shape index: {}]   ;;  %s3083_s8 = inlined_call_operand.vmem [shape: f32[1,32], index: 8, kind: input, shape index: {}]   ;;  %s3084_s9 = inlined_call_operand.vmem [shape: f32[32,32], index: 9, kind: input, shape index: {}]   ;;  %s3085_s10 = inlined_call_operand.vmem [shape: f32[1,32], index: 10, kind: input, shape index: {}]   ;;  %s3086_s11 = inlined_call_operand.vmem [shape: f32[1,32], index: 11, kind: input, shape index: {}]   ;;  %s3087_s12 = inlined_call_operand.vmem [shape: f32[1,32], index: 12, kind: input, shape index: {}]   ;;  %s3088_s13 = inlined_call_operand.vmem [shape: f32[32,128], index: 13, kind: input, shape index: {}]   ;;  %s3089_s14 = inlined_call_operand.vmem [shape: f32[1,128], index: 14, kind: input, shape index: {}]   ;;  %s3090_s15 = inlined_call_operand.hbm [shape: f32[32,128], index: 15, kind: input, shape index: {}]   ;;  %s3091_s16 = inlined_call_operand.vmem [shape: f32[1,128], index: 16, kind: input, shape index: {}]   ;;  %s3092_s17 = inlined_call_operand.vmem [shape: f32[128,32], index: 17, kind: input, shape index: {}]   ;;  %s3093_s18 = inlined_call_operand.vmem [shape: f32[1,32], index: 18, kind: input, shape index: {}]   ;;  %s3094_s19 = inlined_call_operand.hbm [shape: f32[2,8,32], index: 19, kind: output, shape index: {}]  }
   0x1   :  { %3107 = sst [smem:[#allocation15_spill]] %s3075_s0 }
   0x2   :  { %3108 = sst [smem:[#allocation16_spill]] %s3076_s1 }
   0x3   :  { %3109 = sst [smem:[#allocation17_spill]] %s3077_s2 }
   0x4   :  { %3110 = sst [smem:[#allocation18_spill]] %s3078_s3 }
   0x5   :  { %3111 = sst [smem:[#allocation19_spill]] %s3087_s12 }
   0x6   :  { %3112 = sst [smem:[#allocation20_spill]] %s3089_s14 }
   0x7   :  { %3113 = sst [smem:[#allocation21_spill]] %s3090_s15 }
   0x8   :  { %3114 = sst [smem:[#allocation22_spill]] %s3091_s16 }
   0x9   :  { %3115 = sst [smem:[#allocation23_spill]] %s3092_s17 }
   0xa   :  { %3116 = sst [smem:[#allocation24_spill]] %s3093_s18 }
   0xb   :  { %3117 = sst [smem:[#allocation25_spill]] %s3094_s19 }
   0xc   :  { %24 = vsyncpa [#allocation3], 0 }
   0xd   :  { %26 = vsyncpa [#allocation3 + $0x1], 0 }
   0xe   :  { %27 = vsyncpa [#allocation6], 0 }
   0xf   :  { %28 = vsyncpa [#allocation4], 0 }
  0x10   :  { %30 = vsyncpa [#allocation4 + $0x1], 0  ;;  %s2641_s0 = smov 0   ;;  %s2643_s30 = smov 0  }
  0x11   :  { %s2645_s20 = smov 0   ;;  %s2647_s21 = smov 0  }
  0x12 LB: > { %3118 = sst [smem:[#allocation11_spill]] %s2514_s0  ;;  %s2662_s1 = sadd.s32 4294967295, %s2526_s21   ;;  %s2526_s21 = sphi %s2647_s21, %s3150_s21   ;;  %s2522_s20 = sphi %s2645_s20, %s3154_s20   ;;  %s2518_s30 = sphi %s2643_s30, %s3153_s30   ;;  %s2514_s0 = sphi %s2641_s0, %s3152_s0  }
  0x13   : > { %s2065_s22 = sadd.s32 4294967294, %s2526_s21   ;;  %p56_p0 = scmp.ne.s32.totalorder %s2518_s30, %s2514_s0 }
  0x14   : > { %p3103_p1 = scmp.eq.s32.totalorder %s2662_s1, 0  ;;  %p464_p3 = scmp.eq.s32.totalorder %s2065_s22, 1 }
  0x15   : > { %p2066_p5 = scmp.ge.s32.totalorder %s2526_s21, 1  ;;  %p471_p7 = scmp.lt.s32.totalorder %s2526_s21, 3 }
  0x16   : > { %p2671_p4 = por %p3103_p1, %p56_p0  ;;  %p2676_p6 = por %p464_p3, %p56_p0 }
  0x17   : > { %p2681_p8 = pnand %p2066_p5, %p471_p7  ;;  %s2528_s25 = smov [#allocation5]  }
  0x18   : > { %s3119_s2 = scalar_select %p2671_p4, 1, 0 }
  0x19   : > { %s3120_s23 = scalar_select %p2676_p6, 1, 0 }
  0x1a   : > { %s3122_s24 = scalar_select %p2681_p8, 1, 0 }
  0x1b   : > { %3121 = sst [smem:[#allocation12_spill]] %s3120_s23  ;;  %s525_s3 = sshll.u32 %s2528_s25, 4  ;;  %s526_s3 = int_to_ptr.vmem [resolvable:$true] %s525_s3 }
  0x1c   : > { %p2321_p9 = pneg %p2681_p8  ;;  %s2695_s27 = sadd.s32 1, %s2526_s21  }
  0x1d   : > { %3124 = sst [smem:[#allocation13_spill]] %s2695_s27  ;;  %s43_s28 = sadd.s32 1, %s2522_s20 }
  0x1e   : > { %p2690_p11 = pnand %p2321_p9, %p3103_p1  ;;  %s40_s29 = ssub.s32 %s2526_s21, %s2695_s27 }
  0x1f   : > { %s2415_s22 = scalar_lea.vmem %s526_s3, 512  ;;  %p2423_p5 = scmp.lt.s32.totalorder %s526_s3, %s526_s3 }
  0x20   : > { %p2406_p12 = pneg %p2690_p11  ;;  %p2416_p13 = scmp.ne.s32.totalorder %s526_s3, %s2415_s22 }
  0x21   : > { %p2424_p7 = scmp.lt.s32.totalorder %s2415_s22, %s2415_s22 }
  0x22   : > { %p2418_p0 = pnand %p2416_p13, %p2406_p12 }
  0x23   : > { %p2425_p10 = por %p2424_p7, %p2423_p5 }
  0x24   : > { %p2419_p3 = pneg %p2418_p0 }
  0x26   : > { %p2426_p2 = pnand %p2425_p10, %p2419_p3 }
  0x28   : > { %2429 = shalt.err (!%p2426_p2)
}
  0x29   : > { %s2529_s25 = smov 128   ;;  %s2530_s27 = smov 8  }
  0x2a   : > { %s3125_s15 = sld [smem:[#allocation21_spill]]  ;;  %p41_p9 = scmp.eq.s32.totalorder %s40_s29, 0 }
  0x2b   : > { %p50_p12 = scmp.ne.s32.totalorder %s2522_s20, %s2518_s30  ;;  %p51_p10 = scmp.eq.s32.totalorder %s2526_s21, 0 }
  0x2c   : > { %p2334_p2 = scmp.lt.s32.totalorder %s2526_s21, 2  ;;  %p3127_p0 = scmp.eq.s32.totalorder %s2662_s1, 1 }
  0x2d   : > { %s2712_s22 = scalar_select %p41_p9, %s2522_s20, %s43_s28  }
  0x2e   : > { %p52_p13 = por %p51_p10, %p50_p12  ;;  %p2716_p3 = por %p3127_p0, %p50_p12 }
  0x2f   : > { %3126 = sst [smem:[#allocation14_spill]] %s2712_s22  ;;  %s548_s18 = sand.u32 1, %s2522_s20  }
  0x30   : > { %2324 = dma.hbm_to_vmem [thread:$0]  (!%p2690_p11), %s3125_s15, 512, %s526_s3, [#allocation6], %s2529_s25, %s2529_s25, %s2530_s27  }
  0x31   : > { %s3128_s19 = scalar_select %p2716_p3, 1, 0 }
  0x32   : > { %s2070_s16 = sshll.u32 %s2526_s21, 7  ;;  %s2069_s14 = sshll.u32 %s548_s18, 3 }
  0x33   : > { %s3129_s12 = sld [smem:[#allocation15_spill]]  ;;  %s552_s23 = scalar_lea.vmem [#allocation2], %s2069_s14 }
  0x34   : > { %s559_s3 = sshll.u32 %s552_s23, 4  ;;  %p2727_p11 = pnand %p2334_p2, %p52_p13  ;;  %s560_s3 = int_to_ptr.vmem [resolvable:$true] %s559_s3 }
  0x35   : > { %s549_s28 = scalar_lea.sflag [#allocation3], %s548_s18 }
  0x36   : > { %p2432_p7 = pneg %p2727_p11 }
  0x39   : > { %s2725_s0 = scalar_lea.hbm %s3129_s12, %s2070_s16  ;;  %s2435_s25 = scalar_lea.hbm %s3129_s12, 256 }
  0x3a   : > { %s2430_s29 = scalar_lea.hbm %s2725_s0, 128  ;;  %p2436_p10 = scmp.lt.s32.totalorder %s2725_s0, %s3129_s12 }
  0x3b   : > { %p2431_p5 = scmp.ne.s32.totalorder %s2725_s0, %s2430_s29  ;;  %p2437_p2 = scmp.lt.s32.totalorder %s2435_s25, %s2430_s29 }
  0x3d   : > { %p2433_p9 = pnand %p2432_p7, %p2431_p5  ;;  %p2438_p13 = por %p2437_p2, %p2436_p10 }
  0x3f   : > { %p2434_p12 = pneg %p2433_p9 }
  0x41   : > { %p2439_p0 = pnand %p2438_p13, %p2434_p12 }
  0x43   : > { %2442 = shalt.err (!%p2439_p0)
}
  0x44   : > { %s2443_s23 = scalar_lea.vmem %s560_s3, 128  ;;  %s2531_s18 = smov [#allocation2]  }
  0x45   : > { %p2444_p1 = scmp.ne.s32.totalorder %s560_s3, %s2443_s23  ;;  %s2448_s15 = sshll.u32 %s2531_s18, 4  ;;  %s2449_s15 = int_to_ptr.vmem [resolvable:$false] %s2448_s15 }
  0x46   : > { %s2450_s22 = scalar_lea.vmem %s2449_s15, 256  ;;  %p2451_p5 = scmp.lt.s32.totalorder %s560_s3, %s2449_s15 }
  0x47   : > { %p2446_p6 = pnand %p2444_p1, %p2432_p7  ;;  %p2452_p9 = scmp.lt.s32.totalorder %s2450_s22, %s2443_s23 }
  0x49   : > { %p2447_p3 = pneg %p2446_p6  ;;  %p2453_p4 = por %p2452_p9, %p2451_p5 }
  0x4b   : > { %p2454_p8 = pnand %p2453_p4, %p2447_p3 }
  0x4d   : > { %2457 = shalt.err (!%p2454_p8)
}
  0x4e   : > { %2328 = dma.hbm_to_vmem [thread:$0]  (!%p2727_p11), %s2725_s0, 128, %s560_s3, %s549_s28  }
  0x4f   : > { %p3131_p12 = scmp.ne.s32.totalorder %s3122_s24, 0 }
  0x50   : > { %s2748_s29 = sand.u32 (!%p3131_p12), 1, %s2518_s30   ;;  %p3132_p1 = scmp.ne.s32.totalorder (!%p3131_p12), %s3119_s2, 0 }
  0x51   : > { %568 = sbr.rel (%p3131_p12) target bundleno = 2535 (0x9e7), region = 96  ;;  %s2072_s16 = sshll.u32 (!%p3131_p12), %s2748_s29, 3 }
  0x52   : > { %s571_s15 = scalar_lea.sflag (!%p3131_p12), [#allocation3], %s2748_s29  ;;  %s574_s22 = scalar_lea.vmem (!%p3131_p12), [#allocation2], %s2072_s16 }
  0x56   : > { %2501 = dma.done.wait (%p3132_p1), %s571_s15, 128  }
  0x57   : > { %2503 = vsyncadd (%p3132_p1), %s571_s15, 4294967168  ;;  %p3133_p4 = scmp.eq.s32.totalorder %s2662_s1, 0 }
  0x59   : > { %2505 = dma.done.wait (%p3133_p4), [#allocation6], 512   ;;  %p3134_p6 = pmov %p3133_p4 }
  0x5a   : > { %vm636_vm0 = vcmask 261120   ;;  %v2762_v0 = vld [vmem:[%s574_s22] sm:$0xff]  ;;  %s3135_s0 = sld [smem:[#allocation18_spill]]  ;;  %v2532_v8 = vmov 0.0   ;;  %vm2533_vm1 = vmmov 0   ;;  %v752_v21 = vld [vmem:[%s3080_s5 + $0x18] sm:$0xff] }
  0x5b   : > { %2507 = vsyncadd (%p3134_p6), [#allocation6], 4294966784  ;;  %v637_v1 = vsel %vm636_vm0, %v2762_v0, 0.0  ;;  %2172 = vmatprep.subr.mxu0 %v2532_v8  ;;  %2180 = vmatprep.mubr.msk.f32.mxu0 %vm2533_vm1, %v2532_v8  ;;  %s3137_s15 = sld [smem:[#allocation16_spill]]  ;;  %v751_v22 = vld [vmem:[%s3080_s5 + $0x10] sm:$0xff]  ;;  %v750_v23 = vld [vmem:[%s3080_s5 + $0x8] sm:$0xff] }
  0x5c   : > { %638 = vadd.xlane.f32.xlu0 %v637_v1  ;;  %2210 = vmatprep.subr.mxu1 %v2532_v8  ;;  %s3138_s24 = sld [smem:[#allocation17_spill]]  ;;  %v749_v24 = vld [vmem:[%s3080_s5] sm:$0xff]  ;;  %v833_v25 = vld [vmem:[%s3082_s7 + $0x18] sm:$0xff]  ;;  %v832_v26 = vld [vmem:[%s3082_s7 + $0x10] sm:$0xff]  ;;  %s2534_s26 = smov 120   ;;  %vm935_vm2 = vcmask 64512  }
  0x5d   : > { %2212 = vmatprep.mubr.msk.f32.mxu1 %vm2533_vm1, %v2532_v8  ;;  %v831_v27 = vld [vmem:[%s3082_s7 + $0x8] sm:$0xff]  ;;  %v830_v28 = vld [vmem:[%s3082_s7] sm:$0xff]  ;;  %s2535_s18 = smov 112   ;;  %s2538_s14 = smov 16   ;;  %vm1585_vm3 = vcmask 130048   ;;  %vm1587_vm4 = vcmask 195584  }
  0x5e   : > { %v2077_v29 = vld [vmem:[%s3079_s4] ss:$0 sm:$0xff]  ;;  %s3139_s2 = sld [smem:[#allocation19_spill]]  ;;  %p3145_p3 = scmp.ne.s32.totalorder %s3128_s19, 0 }
  0x5f   : > { %v2079_v33 = vld [vmem:[%s3081_s6] ss:$0 sm:$0xff]  ;;  %s3140_s27 = sld [smem:[#allocation23_spill]] }
  0x60   : > { %s3136_s3 = smov %s3135_s0  ;;  %v668_v7 = vld [vmem:[%s3135_s0 + $0x18] sm:$0xff]  ;;  %v2081_v42 = vld [vmem:[%s3083_s8] ss:$0 sm:$0xff]  ;;  %s3141_s22 = sld [smem:[#allocation20_spill]] }
  0x61   : > { %v667_v9 = vld [vmem:[%s3136_s3 + $0x10] sm:$0xff]  ;;  %2173 = vmatpush3.msra.mxu0 %v668_v7  ;;  %v666_v10 = vld [vmem:[%s3136_s3 + $0x8] sm:$0xff]  ;;  %v665_v11 = vld [vmem:[%s3136_s3] sm:$0xff]  ;;  %s3142_s0 = sld [smem:[#allocation22_spill]] }
  0x62   : > { %2174 = vmatprep.subr.mxu0 %v2532_v8  ;;  %v2075_v16 = vld [vmem:[%s3137_s15] ss:$0 sm:$0xff]  ;;  %s2536_s15 = smov 104   ;;  %s3143_s25 = sld [smem:[#allocation24_spill]] }
  0x63   : > { %2175 = vmatpush3.msra.mxu0 %v667_v9  ;;  %v2076_v18 = vld [vmem:[%s3138_s24] ss:$0 sm:$0xff]  ;;  %s1972_s24 = scalar_lea.sflag [#allocation4], %s2748_s29 }
  0x64   : > { %2176 = vmatprep.subr.mxu0 %v2532_v8 }
  0x65   : > { %2177 = vmatpush3.msra.mxu0 %v666_v10 }
  0x66   : > { %2178 = vmatprep.subr.mxu0 %v2532_v8 }
  0x67   : > { %2179 = vmatpush3.msra.mxu0 %v665_v11 }
  0x68   : > { %2183 = vmatprep.subr.mxu0 %v2532_v8 }
  0xe5   : > { %v639_v2 = vpop.xlane.xlu0 %638 }
  0xe6   : > { %v641_v3 = vmul.f32 0.03125, %v639_v2 }
  0xe8   : > { %v642_v4 = vsub.f32 %v2762_v0, %v641_v3 }
  0xea   : > { %v643_v5 = vmul.f32 %v642_v4, %v642_v4 }
  0xec   : > { %v644_v6 = vsel %vm636_vm0, %v643_v5, 0.0 }
  0xed   : > { %645 = vadd.xlane.f32.xlu0 %v644_v6 }
 0x176   : > { %v646_v12 = vpop.xlane.xlu0 %645 }
 0x177   : > { %v647_v13 = vmul.f32 0.03125, %v646_v12 }
 0x179   : > { %v648_v14 = vadd.f32 1e-05, %v647_v13 }
 0x17b   : > { %2380 = vrsqrt.f32 %v648_v14 }
 0x188   : > { %v2381_v15 = vpop.eup %2380 }
 0x189   : > { %v650_v17 = vmul.f32 %v2381_v15, %v642_v4 }
 0x18b   : > { %v657_v19 = vmul.f32 %v2075_v16, %v650_v17 }
 0x18d   : > { %v664_v20 = vadd.f32 %v2076_v18, %v657_v19 }
 0x18f   : > { %2181 = vmatmul.mubr.msk.f32.vlgmr.msra.gmra.mxu0 %vm636_vm0, %v664_v20 }
 0x190   : > { %2184 = vmatpush3.msra.mxu0 %v752_v21  ;;  %2191 = vmatprep.mubr.msk.f32.mxu0 %vm2533_vm1, %v2532_v8 }
 0x191   : > { %2185 = vmatprep.subr.mxu0 %v2532_v8 }
 0x192   : > { %2186 = vmatpush3.msra.mxu0 %v751_v22 }
 0x193   : > { %2187 = vmatprep.subr.mxu0 %v2532_v8 }
 0x194   : > { %2188 = vmatpush3.msra.mxu0 %v750_v23 }
 0x195   : > { %2189 = vmatprep.subr.mxu0 %v2532_v8 }
 0x196   : > { %2190 = vmatpush3.msra.mxu0 %v749_v24 }
 0x197   : > { %2192 = vmatmul.mubr.msk.f32.vlgmr.msra.gmra.mxu0 %vm636_vm0, %v664_v20  ;;  %2194 = vmatprep.subr.mxu0 %v2532_v8 }
 0x198   : > { %2195 = vmatpush3.msra.mxu0 %v833_v25  ;;  %2202 = vmatprep.mubr.msk.f32.mxu0 %vm2533_vm1, %v2532_v8 }
 0x199   : > { %2196 = vmatprep.subr.mxu0 %v2532_v8 }
 0x19a   : > { %2197 = vmatpush3.msra.mxu0 %v832_v26 }
 0x19b   : > { %2198 = vmatprep.subr.mxu0 %v2532_v8 }
 0x19c   : > { %2199 = vmatpush3.msra.mxu0 %v831_v27 }
 0x19d   : > { %2200 = vmatprep.subr.mxu0 %v2532_v8 }
 0x19e   : > { %2201 = vmatpush3.msra.mxu0 %v830_v28 }
 0x19f   : > { %2203 = vmatmul.mubr.msk.f32.vlgmr.msra.gmra.mxu0 %vm636_vm0, %v664_v20  ;;  %2205 = vmatprep.subr.mxu0 %v2532_v8 }
 0x1a0   : > { %2207 = vmatprep.mubr.msk.f32.mxu0 %vm2533_vm1, %v2532_v8 }
 0x24f   : > { %v745_v30 = vpop.f32.mrf.mxu0 }
 0x250   : > { %v746_v31 = vadd.f32 %v2077_v29, %v745_v30 }
 0x251   : > { %v2182_v32 = vpop.f32.mrf.mxu0 }
 0x252   : > { %912 = vrot.lane.b32.xlu1 %v746_v31, %s2534_s26 }
 0x257   : > { %v826_v34 = vpop.f32.mrf.mxu0 }
 0x258   : > { %v827_v35 = vadd.f32 %v2079_v33, %v826_v34 }
 0x259   : > { %v2193_v36 = vpop.f32.mrf.mxu0 }
 0x25a   : > { %921 = vrot.lane.b32.xlu0 %v827_v35, %s2535_s18  ;;  %919 = vrot.lane.b32.xlu1 %v827_v35, %s2534_s26 }
 0x25b   : > { %2206 = vmatpush3.xpose.msk.msra.mxu0 %vm935_vm2, %v827_v35 }
 0x25c   : > { %2215 = vmatprep.subr.mxu0 %v2532_v8 }
 0x25e   : > { %2208 = vmatmul.mubr.msk.f32.vlgmr.msra.gmra.mxu0 %vm935_vm2, %v746_v31  ;;  %914 = vrot.lane.b32.xlu1 %v746_v31, %s2535_s18 }
 0x25f   : > { %v907_v37 = vpop.f32.mrf.mxu0  ;;  %2217 = vmatprep.mubr.msk.f32.mxu0 %vm2533_vm1, %v2532_v8 }
 0x260   : > { %v2861_v43 = vadd.f32 %v2081_v42, %v907_v37 }
 0x261   : > { %v2204_v38 = vpop.f32.mrf.mxu0 }
 0x262   : > { %923 = vrot.lane.b32.xlu1 %v827_v35, %s2536_s15  ;;  %v1592_v38 = vld [vmem:[%s3084_s9 + $0x18] sm:$0xff] }
 0x266   : > { %916 = vrot.lane.b32.xlu1 %v746_v31, %s2536_s15 }
 0x2c4   : > { %v913_v39 = vpop.permute.xlu1 %912 }
 0x2cc   : > { %v922_v40 = vpop.permute.xlu0 %921  ;;  %v920_v41 = vpop.permute.xlu1 %919 }
 0x2cd   : > { %2211 = vmatpush3.xpose.msk.msra.mxu1 %vm935_vm2, %v920_v41  ;;  %2216 = vmatpush3.xpose.msk.msra.mxu0 %vm935_vm2, %v922_v40  ;;  %v1590_v40 = vld [vmem:[%s3084_s9 + $0x8] sm:$0xff] }
 0x2ce   : > { %2225 = vmatprep.subr.mxu0 %v2532_v8  ;;  %2220 = vmatprep.subr.mxu1 %v2532_v8 }
 0x2d0   : > { %2213 = vmatmul.mubr.msk.f32.vlgmr.msra.gmra.mxu1 %vm935_vm2, %v913_v39  ;;  %v915_v44 = vpop.permute.xlu1 %914  ;;  %v1591_v39 = vld [vmem:[%s3084_s9 + $0x10] sm:$0xff] }
 0x2d1   : > { %2218 = vmatmul.mubr.msk.f32.vlgmr.msra.gmra.mxu0 %vm935_vm2, %v915_v44  ;;  %2222 = vmatprep.mubr.msk.f32.mxu1 %vm2533_vm1, %v2532_v8 }
 0x2d2   : > { %2226 = vmatpush3.msra.mxu0 %v2861_v43  ;;  %2227 = vmatprep.mubr.msk.f32.mxu0 %vm2533_vm1, %v2532_v8 }
 0x2d3   : > { %2235 = vmatprep.subr.mxu0 %v2532_v8 }
 0x2d4   : > { %v924_v45 = vpop.permute.xlu1 %923 }
 0x2d5   : > { %2221 = vmatpush3.xpose.msk.msra.mxu1 %vm935_vm2, %v924_v45  ;;  %v1589_v45 = vld [vmem:[%s3084_s9] sm:$0xff] }
 0x2d6   : > { %2230 = vmatprep.subr.mxu1 %v2532_v8 }
 0x2d8   : > { %v917_v46 = vpop.permute.xlu1 %916 }
 0x2d9   : > { %2223 = vmatmul.mubr.msk.f32.vlgmr.msra.gmra.mxu1 %vm935_vm2, %v917_v46 }
 0x2da   : > { %2232 = vmatprep.mubr.msk.f32.mxu1 %vm2533_vm1, %v2532_v8 }
 0x31e   : > { %v1006_v47 = vpop.f32.mrf.mxu0 }
 0x31f   : > { %v1232_v48 = vmul.f32 0.35355338, %v1006_v47 }
 0x320   : > { %v2209_v49 = vpop.f32.mrf.mxu0 }
 0x321   : > { %v1236_v50 = vsel %vm935_vm2, %v1232_v48, -inf }
 0x322   : > { %1237 = vmax.xlane.f32.xlu1 %v1236_v50 }
 0x390   : > { %v1080_v51 = vpop.f32.mrf.mxu1 }
 0x391   : > { %v1233_v52 = vmul.f32 0.35355338, %v1080_v51  ;;  %v1154_v53 = vpop.f32.mrf.mxu0 }
 0x392   : > { %v1234_v54 = vmul.f32 0.35355338, %v1154_v53  ;;  %v2214_v55 = vpop.f32.mrf.mxu1 }
 0x393   : > { %v2219_v56 = vpop.f32.mrf.mxu0  ;;  %v1239_v57 = vsel %vm935_vm2, %v1233_v52, -inf }
 0x394   : > { %1240 = vmax.xlane.f32.xlu0 %v1239_v57  ;;  %v1242_v58 = vsel %vm935_vm2, %v1234_v54, -inf }
 0x395   : > { %1243 = vmax.xlane.f32.xlu1 %v1242_v58 }
 0x399   : > { %v1228_v59 = vpop.f32.mrf.mxu1 }
 0x39a   : > { %v1235_v60 = vmul.f32 0.35355338, %v1228_v59 }
 0x39b   : > { %v2224_v61 = vpop.f32.mrf.mxu1 }
 0x39c   : > { %v1245_v62 = vsel %vm935_vm2, %v1235_v60, -inf }
 0x39d   : > { %1246 = vmax.xlane.f32.xlu1 %v1245_v62 }
 0x3ab   : > { %v1238_v63 = vpop.xlane.xlu1 %1237 }
 0x3ac   : > { %v1248_v1 = vsub.f32 %v1232_v48, %v1238_v63 }
 0x3ae   : > { %v1252_v2 = vmul.f32 1.442695, %v1248_v1 }
 0x3b0   : > { %2382 = vpow2.f32 %v1252_v2  ;;  %v1706_v2 = vld [vmem:[%s3088_s13 + $0x18] sm:$0xff] }
 0x3bd   : > { %v2383_v3 = vpop.eup %2382 }
 0x3be   : > { %v1260_v4 = vsel %vm935_vm2, %v2383_v3, 0.0 }
 0x3bf   : > { %1261 = vadd.xlane.f32.xlu0 %v1260_v4  ;;  %v1789_v4 = vld [vmem:[#allocation5 + $0x10] sm:$0xff] }
 0x41d   : > { %v1241_v5 = vpop.xlane.xlu0 %1240 }
 0x41e   : > { %v1249_v6 = vsub.f32 %v1233_v52, %v1241_v5  ;;  %v1244_v7 = vpop.xlane.xlu1 %1243  ;;  %v1704_v5 = vld [vmem:[%s3088_s13 + $0x8] sm:$0xff] }
 0x41f   : > { %v1250_v9 = vsub.f32 %v1234_v54, %v1244_v7  ;;  %v2095_v54 = vld [vmem:[%s3085_s10] ss:$0 sm:$0xff] }
 0x420   : > { %v1254_v10 = vmul.f32 1.442695, %v1249_v6  ;;  %v1788_v6 = vld [vmem:[#allocation5 + $0x8] sm:$0xff]  ;;  %v1703_v7 = vld [vmem:[%s3088_s13] sm:$0xff] }
 0x421   : > { %v1256_v11 = vmul.f32 1.442695, %v1250_v9  ;;  %v1787_v9 = vld [vmem:[#allocation5] sm:$0xff] }
 0x422   : > { %2384 = vpow2.f32 %v1254_v10 }
 0x423   : > { %2386 = vpow2.f32 %v1256_v11 }
 0x426   : > { %v1247_v17 = vpop.xlane.xlu1 %1246 }
 0x427   : > { %v1251_v18 = vsub.f32 %v1235_v60, %v1247_v17 }
 0x429   : > { %v1258_v19 = vmul.f32 1.442695, %v1251_v18 }
 0x42f   : > { %v2385_v12 = vpop.eup %2384 }
 0x430   : > { %v2387_v13 = vpop.eup %2386  ;;  %v1263_v14 = vsel %vm935_vm2, %v2385_v12, 0.0 }
 0x431   : > { %1264 = vadd.xlane.f32.xlu1 %v1263_v14  ;;  %v1266_v15 = vsel %vm935_vm2, %v2387_v13, 0.0  ;;  %v2097_v14 = vld [vmem:[%s3086_s11] ss:$0 sm:$0xff] }
 0x432   : > { %1267 = vadd.xlane.f32.xlu0 %v1266_v15 }
 0x442   : > { %929 = vrot.lane.b32.xlu1 %v2861_v43, %s2535_s18 }
 0x448   : > { %v1262_v16 = vpop.xlane.xlu0 %1261  ;;  %926 = vrot.lane.b32.xlu0 %v2861_v43, %s2534_s26  ;;  %s2537_s26 = smov 8  }
 0x449   : > { %2388 = vrcp.f32 %v1262_v16  ;;  %v2098_v16 = vld [vmem:[%s3139_s2] ss:$0 sm:$0xff] }
 0x44a   : > { %2390 = vpow2.f32 %v1258_v19  ;;  %v1891_v19 = vld [vmem:[%s3140_s27 + $0x78] sm:$0xff] }
 0x456   : > { %v2389_v20 = vpop.eup %2388 }
 0x457   : > { %v1276_v21 = vmul.f32 %v2389_v20, %v2383_v3  ;;  %v2391_v22 = vpop.eup %2390  ;;  %v1790_v3 = vld [vmem:[#allocation5 + $0x18] sm:$0xff]  ;;  %v1890_v20 = vld [vmem:[%s3140_s27 + $0x70] sm:$0xff] }
 0x458   : > { %v1269_v23 = vsel %vm935_vm2, %v2391_v22, 0.0 }
 0x459   : > { %2228 = vmatmul.mubr.msk.f32.vlgmr.msra.gmra.mxu0 %vm935_vm2, %v1276_v21  ;;  %v1889_v21 = vld [vmem:[%s3140_s27 + $0x68] sm:$0xff] }
 0x45a   : > { %2237 = vmatprep.mubr.msk.f32.mxu0 %vm2533_vm1, %v2532_v8 }
 0x466   : > { %1270 = vadd.xlane.f32.xlu1 %v1269_v23  ;;  %v1887_v23 = vld [vmem:[%s3140_s27 + $0x58] sm:$0xff] }
 0x477   : > { %932 = vrot.lane.b32.xlu1 %v2861_v43, %s2536_s15  ;;  %s2539_s15 = smov 24  }
 0x4ba   : > { %v1265_v24 = vpop.xlane.xlu1 %1264 }
 0x4bb   : > { %2392 = vrcp.f32 %v1265_v24  ;;  %v1268_v25 = vpop.xlane.xlu0 %1267  ;;  %v1886_v24 = vld [vmem:[%s3140_s27 + $0x50] sm:$0xff] }
 0x4bc   : > { %2394 = vrcp.f32 %v1268_v25  ;;  %v1885_v25 = vld [vmem:[%s3140_s27 + $0x48] sm:$0xff] }
 0x4be   : > { %v930_v26 = vpop.permute.xlu1 %929 }
 0x4bf   : > { %v927_v27 = vpop.permute.xlu0 %926  ;;  %2236 = vmatpush3.msra.mxu0 %v930_v26  ;;  %v1884_v26 = vld [vmem:[%s3140_s27 + $0x40] sm:$0xff] }
 0x4c0   : > { %2231 = vmatpush3.msra.mxu1 %v927_v27  ;;  %2245 = vmatprep.subr.mxu0 %v2532_v8  ;;  %v1883_v27 = vld [vmem:[%s3140_s27 + $0x38] sm:$0xff] }
 0x4c1   : > { %2240 = vmatprep.subr.mxu1 %v2532_v8 }
 0x4c8   : > { %v2393_v28 = vpop.eup %2392 }
 0x4c9   : > { %v2395_v29 = vpop.eup %2394  ;;  %v1277_v30 = vmul.f32 %v2393_v28, %v2385_v12  ;;  %v1882_v28 = vld [vmem:[%s3140_s27 + $0x30] sm:$0xff] }
 0x4ca   : > { %v1278_v31 = vmul.f32 %v2395_v29, %v2387_v13  ;;  %v1881_v29 = vld [vmem:[%s3140_s27 + $0x28] sm:$0xff] }
 0x4cb   : > { %2233 = vmatmul.mubr.msk.f32.vlgmr.msra.gmra.mxu1 %vm935_vm2, %v1277_v30  ;;  %v1880_v30 = vld [vmem:[%s3140_s27 + $0x20] sm:$0xff] }
 0x4cc   : > { %2238 = vmatmul.mubr.msk.f32.vlgmr.msra.gmra.mxu0 %vm935_vm2, %v1278_v31  ;;  %2242 = vmatprep.mubr.msk.f32.mxu1 %vm2533_vm1, %v2532_v8  ;;  %v1879_v31 = vld [vmem:[%s3140_s27 + $0x18] sm:$0xff] }
 0x4cd   : > { %2253 = vmatprep.mubr.msk.f32.mxu0 %vm2533_vm1, %v2532_v8  ;;  %2246 = vmatpush3.msra.mxu0 %v1592_v38 }
 0x4ce   : > { %2247 = vmatprep.subr.mxu0 %v2532_v8 }
 0x4cf   : > { %2248 = vmatpush3.msra.mxu0 %v1591_v39 }
 0x4d0   : > { %2249 = vmatprep.subr.mxu0 %v2532_v8 }
 0x4d1   : > { %2250 = vmatpush3.msra.mxu0 %v1590_v40 }
 0x4d2   : > { %2251 = vmatprep.subr.mxu0 %v2532_v8 }
 0x4d3   : > { %2252 = vmatpush3.msra.mxu0 %v1589_v45 }
 0x4d4   : > { %2267 = vmatprep.subr.mxu0 %v2532_v8 }
 0x4ef   : > { %v1271_v32 = vpop.xlane.xlu1 %1270 }
 0x4f0   : > { %2396 = vrcp.f32 %v1271_v32  ;;  %v1878_v32 = vld [vmem:[%s3140_s27 + $0x10] sm:$0xff] }
 0x4f3   : > { %v933_v33 = vpop.permute.xlu1 %932 }
 0x4f4   : > { %2241 = vmatpush3.msra.mxu1 %v933_v33  ;;  %v1877_v33 = vld [vmem:[%s3140_s27 + $0x8] sm:$0xff] }
 0x4f5   : > { %2256 = vmatprep.subr.mxu1 %v2532_v8 }
 0x4fd   : > { %v2397_v34 = vpop.eup %2396 }
 0x4fe   : > { %v1279_v35 = vmul.f32 %v2397_v34, %v2391_v22  ;;  %v1888_v22 = vld [vmem:[%s3140_s27 + $0x60] sm:$0xff] }
 0x4ff   : > { %v1876_v34 = vld [vmem:[%s3140_s27] sm:$0xff] }
 0x500   : > { %2243 = vmatmul.mubr.msk.f32.vlgmr.msra.gmra.mxu1 %vm935_vm2, %v1279_v35  ;;  %v2099_v35 = vld [vmem:[%s3141_s22] ss:$0 sm:$0xff]  ;;  %s3144_s22 = sld [smem:[#allocation25_spill]] }
 0x501   : > { %2264 = vmatprep.mubr.msk.f32.mxu1 %vm2533_vm1, %v2532_v8  ;;  %2257 = vmatpush3.msra.mxu1 %v1706_v2 }
 0x502   : > { %2258 = vmatprep.subr.mxu1 %v2532_v8 }
 0x519   : > { %v1349_v36 = vpop.f32.mrf.mxu0 }
 0x51b   : > { %v2229_v37 = vpop.f32.mrf.mxu0 }
 0x58b   : > { %v1422_v41 = vpop.f32.mrf.mxu1 }
 0x58c   : > { %1573 = vrot.lane.b32.xlu0 %v1422_v41, %s2537_s26  ;;  %v1495_v42 = vpop.f32.mrf.mxu0  ;;  %s2106_s26 = sshll.u32 %s2662_s1, 7  ;;  %s2540_s1 = smov [#allocation7]  }
 0x58d   : > { %v2234_v43 = vpop.f32.mrf.mxu1  ;;  %1577 = vrot.lane.b32.xlu1 %v1495_v42, %s2538_s14  ;;  %s632_s14 = scalar_lea.vmem [#allocation7], %s2072_s16  ;;  %s1983_s2 = scalar_lea.hbm %s3144_s22, %s2106_s26 }
 0x58e   : > { %v2239_v44 = vpop.f32.mrf.mxu0  ;;  %s1985_s23 = sshll.u32 %s632_s14, 4  ;;  %s2462_s16 = sshll.u32 %s2540_s1, 4  ;;  %s1986_s23 = int_to_ptr.vmem [resolvable:$true] %s1985_s23  ;;  %s2463_s16 = int_to_ptr.vmem [resolvable:$false] %s2462_s16 }
 0x58f   : > { %s2464_s28 = scalar_lea.vmem %s2463_s16, 256  ;;  %p2465_p10 = scmp.lt.s32.totalorder %s1986_s23, %s2463_s16 }
 0x5c0   : > { %v1568_v46 = vpop.f32.mrf.mxu1 }
 0x5c1   : > { %1581 = vrot.lane.b32.xlu0 %v1568_v46, %s2539_s15 }
 0x5c2   : > { %v2244_v47 = vpop.f32.mrf.mxu1 }
 0x5fe   : > { %v1574_v48 = vpop.permute.xlu0 %1573 }
 0x5ff   : > { %v1584_v49 = vsel %vm935_vm2, %v1349_v36, %v1574_v48  ;;  %v1578_v50 = vpop.permute.xlu1 %1577  ;;  %v2104_v48 = vld [vmem:[%s3143_s25] ss:$0 sm:$0xff] }
 0x600   : > { %v1586_v51 = vsel %vm1585_vm3, %v1584_v49, %v1578_v50 }
 0x633   : > { %v1582_v52 = vpop.permute.xlu0 %1581 }
 0x634   : > { %v1588_v53 = vsel %vm1587_vm4, %v1586_v51, %v1582_v52 }
 0x635   : > { %2254 = vmatmul.mubr.msk.f32.vlgmr.msra.gmra.mxu0 %vm636_vm0, %v1588_v53 }
 0x636   : > { %2275 = vmatprep.mubr.msk.f32.mxu0 %vm2533_vm1, %v2532_v8  ;;  %2268 = vmatpush3.msra.mxu0 %v1790_v3 }
 0x637   : > { %2269 = vmatprep.subr.mxu0 %v2532_v8 }
 0x638   : > { %2270 = vmatpush3.msra.mxu0 %v1789_v4 }
 0x639   : > { %2271 = vmatprep.subr.mxu0 %v2532_v8 }
 0x63a   : > { %2272 = vmatpush3.msra.mxu0 %v1788_v6 }
 0x63b   : > { %2273 = vmatprep.subr.mxu0 %v2532_v8 }
 0x63c   : > { %2274 = vmatpush3.msra.mxu0 %v1787_v9 }
 0x6f5   : > { %v1669_v55 = vpop.f32.mrf.mxu0 }
 0x6f6   : > { %v1670_v56 = vadd.f32 %v2095_v54, %v1669_v55 }
 0x6f7   : > { %v2255_v57 = vpop.f32.mrf.mxu0 }
 0x6f8   : > { %v2929_v58 = vadd.f32 %v1670_v56, %v2762_v0  ;;  %v1705_v0 = vld [vmem:[%s3088_s13 + $0x10] sm:$0xff] }
 0x6f9   : > { %2259 = vmatpush3.msra.mxu1 %v1705_v0 }
 0x6fa   : > { %v1676_v59 = vsel %vm636_vm0, %v2929_v58, 0.0  ;;  %2260 = vmatprep.subr.mxu1 %v2532_v8 }
 0x6fb   : > { %1677 = vadd.xlane.f32.xlu1 %v1676_v59  ;;  %2261 = vmatpush3.msra.mxu1 %v1704_v5 }
 0x6fc   : > { %2262 = vmatprep.subr.mxu1 %v2532_v8 }
 0x6fd   : > { %2263 = vmatpush3.msra.mxu1 %v1703_v7 }
 0x6fe   : > { %2278 = vmatprep.subr.mxu1 %v2532_v8 }
 0x784   : > { %v1678_v60 = vpop.xlane.xlu1 %1677 }
 0x785   : > { %v1679_v61 = vmul.f32 0.03125, %v1678_v60 }
 0x787   : > { %v1680_v62 = vsub.f32 %v2929_v58, %v1679_v61 }
 0x789   : > { %v1681_v63 = vmul.f32 %v1680_v62, %v1680_v62 }
 0x78b   : > { %v1682_v1 = vsel %vm636_vm0, %v1681_v63, 0.0 }
 0x78c   : > { %1683 = vadd.xlane.f32.xlu0 %v1682_v1 }
 0x815   : > { %v1684_v10 = vpop.xlane.xlu0 %1683 }
 0x816   : > { %v1685_v11 = vmul.f32 0.03125, %v1684_v10 }
 0x818   : > { %v1686_v12 = vadd.f32 1e-05, %v1685_v11 }
 0x81a   : > { %2398 = vrsqrt.f32 %v1686_v12 }
 0x827   : > { %v2399_v13 = vpop.eup %2398 }
 0x828   : > { %v1688_v15 = vmul.f32 %v2399_v13, %v1680_v62 }
 0x82a   : > { %v1695_v17 = vmul.f32 %v2097_v14, %v1688_v15 }
 0x82c   : > { %v1702_v18 = vadd.f32 %v2098_v16, %v1695_v17 }
 0x82e   : > { %2265 = vmatmul.mubr.msk.f32.vlgmr.msra.gmra.mxu1 %vm636_vm0, %v1702_v18  ;;  %2276 = vmatmul.mubr.msk.f32.vlgmr.msra.gmra.mxu0 %vm636_vm0, %v1702_v18 }
 0x82f   : > { %2310 = vmatprep.mubr.msk.f32.mxu1 %vm2533_vm1, %v2532_v8  ;;  %2279 = vmatpush3.msra.mxu1 %v1891_v19 }
 0x830   : > { %2280 = vmatprep.subr.mxu1 %v2532_v8 }
 0x831   : > { %2281 = vmatpush3.msra.mxu1 %v1890_v20 }
 0x832   : > { %2282 = vmatprep.subr.mxu1 %v2532_v8 }
 0x833   : > { %2283 = vmatpush3.msra.mxu1 %v1889_v21 }
 0x834   : > { %2284 = vmatprep.subr.mxu1 %v2532_v8 }
 0x835   : > { %2285 = vmatpush3.msra.mxu1 %v1888_v22 }
 0x836   : > { %2286 = vmatprep.subr.mxu1 %v2532_v8 }
 0x837   : > { %2287 = vmatpush3.msra.mxu1 %v1887_v23 }
 0x838   : > { %2288 = vmatprep.subr.mxu1 %v2532_v8 }
 0x839   : > { %2289 = vmatpush3.msra.mxu1 %v1886_v24 }
 0x83a   : > { %2290 = vmatprep.subr.mxu1 %v2532_v8 }
 0x83b   : > { %2291 = vmatpush3.msra.mxu1 %v1885_v25 }
 0x83c   : > { %2292 = vmatprep.subr.mxu1 %v2532_v8 }
 0x83d   : > { %2293 = vmatpush3.msra.mxu1 %v1884_v26 }
 0x83e   : > { %2294 = vmatprep.subr.mxu1 %v2532_v8 }
 0x83f   : > { %2295 = vmatpush3.msra.mxu1 %v1883_v27 }
 0x840   : > { %2296 = vmatprep.subr.mxu1 %v2532_v8 }
 0x841   : > { %2297 = vmatpush3.msra.mxu1 %v1882_v28 }
 0x842   : > { %2298 = vmatprep.subr.mxu1 %v2532_v8 }
 0x843   : > { %2299 = vmatpush3.msra.mxu1 %v1881_v29 }
 0x844   : > { %2300 = vmatprep.subr.mxu1 %v2532_v8 }
 0x845   : > { %2301 = vmatpush3.msra.mxu1 %v1880_v30 }
 0x846   : > { %2302 = vmatprep.subr.mxu1 %v2532_v8 }
 0x847   : > { %2303 = vmatpush3.msra.mxu1 %v1879_v31 }
 0x848   : > { %2304 = vmatprep.subr.mxu1 %v2532_v8 }
 0x849   : > { %2305 = vmatpush3.msra.mxu1 %v1878_v32 }
 0x84a   : > { %2306 = vmatprep.subr.mxu1 %v2532_v8 }
 0x84b   : > { %2307 = vmatpush3.msra.mxu1 %v1877_v33 }
 0x84c   : > { %2308 = vmatprep.subr.mxu1 %v2532_v8  ;;  %v2101_v8 = vld [vmem:[%s3142_s0] ss:$0 sm:$0xff]  ;;  %s2458_s0 = scalar_lea.vmem %s1986_s23, 128 }
 0x84d   : > { %2309 = vmatpush3.msra.mxu1 %v1876_v34  ;;  %p2459_p8 = scmp.ne.s32.totalorder %s1986_s23, %s2458_s0  ;;  %p2466_p2 = scmp.lt.s32.totalorder %s2464_s28, %s2458_s0 }
 0x84f   : > { %p2460_p11 = pnand %p2459_p8, %p3145_p3  ;;  %p2467_p13 = por %p2466_p2, %p2465_p10 }
 0x851   : > { %p2461_p7 = pneg %p2460_p11 }
 0x853   : > { %p2468_p0 = pnand %p2467_p13, %p2461_p7 }
 0x8ee   : > { %v1783_v36 = vpop.f32.mrf.mxu1  ;;  %v1864_v37 = vpop.f32.mrf.mxu0 }
 0x8ef   : > { %v1784_v38 = vadd.f32 %v2099_v35, %v1783_v36  ;;  %v1865_v46 = vadd.f32 %v2101_v8, %v1864_v37 }
 0x8f0   : > { %v2266_v39 = vpop.f32.mrf.mxu1  ;;  %v2277_v40 = vpop.f32.mrf.mxu0 }
 0x8f1   : > { %v2103_v41 = vmul.f32 -1.442695, %v1784_v38 }
 0x8f3   : > { %2400 = vpow2.f32 %v2103_v41 }
 0x900   : > { %v2401_v42 = vpop.eup %2400 }
 0x901   : > { %v1871_v43 = vadd.f32 1.0, %v2401_v42 }
 0x903   : > { %2402 = vrcp.f32 %v1871_v43 }
 0x910   : > { %v2403_v44 = vpop.eup %2402 }
 0x911   : > { %v1874_v45 = vmul.f32 %v2403_v44, %v1784_v38 }
 0x913   : > { %v1875_v47 = vmul.f32 %v1874_v45, %v1865_v46 }
 0x915   : > { %2311 = vmatmul.mubr.f32.vlgmr.msra.gmra.mxu1 %v1875_v47 }
 0x9d5   : > { %v1965_v49 = vpop.f32.mrf.mxu1 }
 0x9d6   : > { %v1966_v50 = vadd.f32 %v2104_v48, %v1965_v49 }
 0x9d7   : > { %v2312_v51 = vpop.f32.mrf.mxu1 }
 0x9d8   : > { %v1969_v52 = vadd.f32 %v1966_v50, %v2929_v58 }
 0x9da   : > { %1970 = vst.msk [vmem:[%s632_s14] sm:$0xff] %vm636_vm0, %v1969_v52 }
 0x9db   : > { %2471 = shalt.err (!%p2468_p0)
}
 0x9dc   : > { %s2472_s17 = scalar_lea.hbm %s1983_s2, 128  ;;  %s2476_s26 = scalar_lea.hbm %s3144_s22, 256 }
 0x9dd   : > { %p2473_p5 = scmp.ne.s32.totalorder %s1983_s2, %s2472_s17  ;;  %p2477_p1 = scmp.lt.s32.totalorder %s1983_s2, %s3144_s22 }
 0x9de   : > { %p2478_p4 = scmp.lt.s32.totalorder %s2476_s26, %s2472_s17 }
 0x9df   : > { %p2474_p9 = pnand %p2473_p5, %p3145_p3 }
 0x9e0   : > { %p2479_p6 = por %p2478_p4, %p2477_p1 }
 0x9e1   : > { %p2475_p12 = pneg %p2474_p9 }
 0x9e3   : > { %p2480_p8 = pnand %p2479_p6, %p2475_p12 }
 0x9e5   : > { %2483 = shalt.err (!%p2480_p8)
}
 0x9e6   : > { %2319 = dma.vmem_to_hbm [thread:$0]  (%p3145_p3), %s1986_s23, 128, %s1983_s2, %s1972_s24  }
 0x9e7 PF: > { %s3146_s15 = sld [smem:[#allocation11_spill]]  ;;  %p3149_p7 = scmp.ge.s32.totalorder %s2526_s21, 2 }
 0x9e8   : > { %s3147_s0 = sld [smem:[#allocation12_spill]] }
 0x9ed   : > { %s1997_s1 = sand.u32 1, %s3146_s15  }
 0x9ee   : > { %p3148_p11 = scmp.ne.s32.totalorder %s3147_s0, 0  ;;  %s1998_s16 = scalar_lea.sflag [#allocation4], %s1997_s1 }
 0x9f0   : > { %p2330_p10 = pnand %p3149_p7, %p3148_p11 }
 0x9f2   : > { %p2331_p2 = pneg %p2330_p10 }
 0x9f4   : > { %2509 = dma.done.wait (%p2331_p2), %s1998_s16, 128  }
 0x9f5   : > { %2511 = vsyncadd (%p2331_p2), %s1998_s16, 4294967168  ;;  %s3150_s21 = sld [smem:[#allocation13_spill]]  ;;  %s3152_s0 = smov %s2518_s30 }
 0x9f6   : > { %s3151_s28 = sld [smem:[#allocation14_spill]]  ;;  %s3153_s30 = smov %s2522_s20 }
 0x9fb   : > { %p33_p13 = scmp.ge.s32.totalorder %s3150_s21, 4  }
 0x9fc   : > { %s3154_s20 = smov %s3151_s28 }
 0x9fd   :  { %35 = sbr.rel (!%p33_p13) target bundleno = 18 (0x12), region = 145 }
 0xa02   :  { %2003 = vsyncpa [#allocation3], 1 }
 0xa03   :  { %2005 = vsyncpa [#allocation3 + $0x1], 1 }
 0xa04   :  { %2006 = vsyncpa [#allocation6], 1 }
 0xa05   :  { %2007 = vsyncpa [#allocation4], 1 }
 0xa06   :  { %2009 = vsyncpa [#allocation4 + $0x1], 1 }

</bundles_post_ra>
